<compile_context>
chip_gen: v7x
topology: tpu7x:2x2x1
jax: 0.10.0
libtpu: 0.0.40
codegen_flags: <defaults>
</compile_context>

<pallas_src>
import jax
import jax.numpy as jnp
import numpy as np
from jax.experimental import pallas as pl
from jax.experimental.pallas import tpu as pltpu

OUT = 10        # fc1 output features
OUT_PAD = 128   # lane-dense padded output width


def mlp_block_kernel(x_ref, w_ref, b_ref, o_ref):
    # x_ref: (TB, 384, 25) f32/bf16   w_ref: (384, 128) f32 (pre-scaled by 1/25, zero-padded)
    # b_ref: (1, 128) f32 (zero-padded)   o_ref: (TB, 128) f32
    # Spatial sum over the lane axis == 5x5 avg pool (scale folded into w_ref).
    pooled = jnp.sum(x_ref[...].astype(jnp.float32), axis=-1)          # (TB, 384)
    y = jnp.dot(pooled, w_ref[...], preferred_element_type=jnp.float32) + b_ref[...]
    # TODO(synk): Dropout(0.2) is identity in eval mode; training-mode RNG masking not implemented.
    o_ref[...] = jnp.maximum(y, 0.0).astype(o_ref.dtype)


def mlp_block_forward(x_nchw, weight, bias, *, tb=64):
    """x_nchw: (N, 384, 5, 5); weight: (10, 384); bias: (10,) -> (N, 10) f32.

    tb: batch rows per grid step. The (384, 25) tile pads its lane dim 25 -> 128 in VMEM,
    so each batch row costs ~192 KiB (f32). tb=64 => ~25 MiB double-buffered, which fits
    every generation (v5e/v6e/v7x) under the explicit 48 MiB VMEM limit below. On v6e
    (128 MiB physical VMEM) tb=128 is also fine if vmem_limit_bytes is raised accordingly.
    """
    n, c, h, w = x_nchw.shape
    assert c == 384 and h == 5 and w == 5, "MLPBlock expects (N, 384, 5, 5) inputs"
    hw = h * w

    # Free reshape (no HBM data movement): NCHW -> (N, C, HW).
    x = x_nchw.reshape(n, c, hw)

    # Lane-dense, pre-scaled parameters (one-time O(384x128) wrapper cost).
    w_scaled = (weight.astype(jnp.float32) / float(hw)).T                     # (384, 10)
    w_pad = jnp.zeros((c, OUT_PAD), jnp.float32).at[:, :OUT].set(w_scaled)    # (384, 128)
    b_pad = jnp.zeros((1, OUT_PAD), jnp.float32).at[:, :OUT].set(
        bias.astype(jnp.float32))                                             # (1, 128)

    # Tile the batch; pad N up to a multiple of the block so every block is full.
    tb = max(1, min(tb, n))
    n_pad = tb * pl.cdiv(n, tb)
    if n_pad != n:
        x = jnp.pad(x, ((0, n_pad - n), (0, 0), (0, 0)))

    out = pl.pallas_call(
        mlp_block_kernel,
        out_shape=jax.ShapeDtypeStruct((n_pad, OUT_PAD), jnp.float32),
        grid_spec=pltpu.PrefetchScalarGridSpec(
            num_scalar_prefetch=0,
            grid=(n_pad // tb,),
            in_specs=[
                pl.BlockSpec((tb, c, hw), lambda i: (i, 0, 0)),    # streamed activations
                pl.BlockSpec((c, OUT_PAD), lambda i: (0, 0)),      # weights: resident
                pl.BlockSpec((1, OUT_PAD), lambda i: (0, 0)),      # bias: resident
            ],
            out_specs=pl.BlockSpec((tb, OUT_PAD), lambda i: (i, 0)),
        ),
        compiler_params=pltpu.CompilerParams(
            dimension_semantics=("parallel",),          # shard batch blocks across TCs (v7x)
            vmem_limit_bytes=48 * 1024 * 1024,          # safe on 64 MiB (v7x) .. 128 MiB VMEM
        ),
    )(x, w_pad, b_pad)

    return out[:n, :OUT]


if __name__ == "__main__":
    key = jax.random.PRNGKey(0)
    k_x, k_w, k_b = jax.random.split(key, 3)

    N, C, H, W = 2, 384, 5, 5

    # Deterministic parameter init matching the module's __init__ shapes.
    # fc1.weight: xavier_normal_ on (10, 384) -> std = sqrt(2 / (fan_in + fan_out)).
    xavier_std = float(np.sqrt(2.0 / (C + OUT)))
    weight = jax.random.normal(k_w, (OUT, C), dtype=jnp.float32) * xavier_std
    # fc1.bias: PyTorch default uniform(-1/sqrt(fan_in), 1/sqrt(fan_in)).
    bound = float(1.0 / np.sqrt(C))
    bias = jax.random.uniform(k_b, (OUT,), dtype=jnp.float32, minval=-bound, maxval=bound)

    x = jax.random.normal(k_x, (N, C, H, W), dtype=jnp.float32)

    out = jax.block_until_ready(mlp_block_forward(x, weight, bias))

    # Pure-JAX reference of the module's eval-mode forward pass.
    ref = jnp.maximum(jnp.mean(x, axis=(2, 3)) @ weight.T + bias, 0.0)
    np.testing.assert_allclose(np.asarray(out), np.asarray(ref), rtol=1e-4, atol=1e-4)

    print("KERNEL_OK")
</pallas_src>

<mosaic_0001>
module attributes {stable_mosaic.version = 11 : i64} {
  func.func @mlp_block_kernel(%arg0: i32, %arg1: memref<2x384x25xf32, #tpu.memory_space<vmem>>, %arg2: memref<384x128xf32, #tpu.memory_space<vmem>>, %arg3: memref<1x128xf32, #tpu.memory_space<vmem>>, %arg4: memref<2x128xf32, #tpu.memory_space<vmem>>) attributes {dimension_semantics = [#tpu.dimension_semantics<parallel>], iteration_bounds = array<i64: 1>, scalar_prefetch = 0 : i64, scratch_operands = 0 : i64, tpu.core_type = #tpu.core_type<tc>, window_params = [{transform_indices = @transform_0, window_bounds = array<i64: 2, 384, 25>}, {pipeline_mode = #tpu.pipeline_mode<synchronous>, transform_indices = @transform_1, window_bounds = array<i64: 384, 128>}, {pipeline_mode = #tpu.pipeline_mode<synchronous>, transform_indices = @transform_2, window_bounds = array<i64: 1, 128>}, {transform_indices = @transform_3, window_bounds = array<i64: 2, 128>}]} {
    %c0 = arith.constant 0 : index
    %c0_0 = arith.constant 0 : index
    %c0_1 = arith.constant 0 : index
    %0 = vector.load %arg1[%c0, %c0_0, %c0_1] : memref<2x384x25xf32, #tpu.memory_space<vmem>>, vector<2x384x25xf32>
    %cst = arith.constant dense<0.000000e+00> : vector<2x384xf32>
    %1 = vector.multi_reduction <add>, %0, %cst [2] : vector<2x384x25xf32> to vector<2x384xf32>
    %c0_2 = arith.constant 0 : index
    %c0_3 = arith.constant 0 : index
    %2 = vector.load %arg2[%c0_2, %c0_3] : memref<384x128xf32, #tpu.memory_space<vmem>>, vector<384x128xf32>
    %cst_4 = arith.constant dense<0.000000e+00> : vector<2x128xf32>
    %3 = tpu.matmul %1, %2, %cst_4 {dimension_numbers = #tpu.dot_dimension_numbers<[1], [0], [0], [1], [0, 0, 1, 1], [], []>} : vector<2x384xf32>, vector<384x128xf32>, vector<2x128xf32> -> vector<2x128xf32>
    %c0_5 = arith.constant 0 : index
    %c0_6 = arith.constant 0 : index
    %4 = vector.load %arg3[%c0_5, %c0_6] : memref<1x128xf32, #tpu.memory_space<vmem>>, vector<1x128xf32>
    %5 = vector.broadcast %4 : vector<1x128xf32> to vector<2x128xf32>
    %6 = arith.addf %3, %5 : vector<2x128xf32>
    %cst_7 = arith.constant 0.000000e+00 : f32
    %7 = vector.broadcast %cst_7 : f32 to vector<2x128xf32>
    %8 = arith.maximumf %6, %7 : vector<2x128xf32>
    %c0_8 = arith.constant 0 : index
    %c0_9 = arith.constant 0 : index
    %9 = vector.load %arg4[%c0_8, %c0_9] : memref<2x128xf32, #tpu.memory_space<vmem>>, vector<2x128xf32>
    tpu.vector_store %arg4[%c0_8, %c0_9], %8 {strides = array<i32>} : memref<2x128xf32, #tpu.memory_space<vmem>>, vector<2x128xf32>,
    return
  }
  func.func @transform_0(%arg0: i32) -> (i32, i32, i32) {
    %c0_i32 = arith.constant 0 : i32
    %c0_i32_0 = arith.constant 0 : i32
    %c0_i32_1 = arith.constant 0 : i32
    return %arg0, %c0_i32, %c0_i32_0 : i32, i32, i32
  }
  func.func @transform_1(%arg0: i32) -> (i32, i32) {
    %c0_i32 = arith.constant 0 : i32
    %c0_i32_0 = arith.constant 0 : i32
    %c0_i32_1 = arith.constant 0 : i32
    return %c0_i32, %c0_i32_0 : i32, i32
  }
  func.func @transform_2(%arg0: i32) -> (i32, i32) {
    %c0_i32 = arith.constant 0 : i32
    %c0_i32_0 = arith.constant 0 : i32
    %c0_i32_1 = arith.constant 0 : i32
    return %c0_i32, %c0_i32_0 : i32, i32
  }
  func.func @transform_3(%arg0: i32) -> (i32, i32) {
    %c0_i32 = arith.constant 0 : i32
    %c0_i32_0 = arith.constant 0 : i32
    return %arg0, %c0_i32 : i32, i32
  }
}

</mosaic_0001>

<bundles_post_ra>
// kernel: tpu_custom_call.1
= control target key start
LH: loop header
LB: loop body
LE: loop exit
PB: predicated region body
PF: predicated region fallthrough
CT: control target
= control target key end

     0   :  { %vm111_vm0 = vcmask 203776   ;;  %s2299_s0 = inlined_call_operand.vmem [shape: f32[2,384,25], index: 0, kind: input, shape index: {}]   ;;  %s2300_s1 = inlined_call_operand.vmem [shape: f32[384,128], index: 1, kind: input, shape index: {}]   ;;  %s2301_s2 = inlined_call_operand.vmem [shape: f32[1,128], index: 2, kind: input, shape index: {}]   ;;  %s2302_s3 = inlined_call_operand.hbm [shape: f32[2,128], index: 3, kind: output, shape index: {}]  }
   0x1   :  { %v79_v0 = vld [vmem:[%s2299_s0 + $0x200] sm:$0xff]  ;;  %v80_v2 = vld [vmem:[%s2299_s0 + $0x208] sm:$0xff]  ;;  %v33_v13 = vld [vmem:[%s2299_s0 + $0x90] sm:$0xff] }
   0x2   :  { %v31_v1 = vld [vmem:[%s2299_s0 + $0x80] sm:$0xff]  ;;  %v304_v3 = vsel %vm111_vm0, %v79_v0, 0.0  ;;  %v32_v5 = vld [vmem:[%s2299_s0 + $0x88] sm:$0xff]  ;;  %v307_v6 = vsel %vm111_vm0, %v80_v2, 0.0  ;;  %v166_v15 = vsel %vm111_vm0, %v33_v13, 0.0  ;;  %v81_v16 = vld [vmem:[%s2299_s0 + $0x210] sm:$0xff] }
   0x3   :  { %v160_v4 = vsel %vm111_vm0, %v31_v1, 0.0  ;;  %305 = vadd.xlane.f32.xlu1 %v304_v3  ;;  %v163_v7 = vsel %vm111_vm0, %v32_v5, 0.0  ;;  %v16_v8 = vld [vmem:[%s2299_s0 + $0x8] sm:$0xff]  ;;  %v15_v9 = vld [vmem:[%s2299_s0] sm:$0xff]  ;;  %v310_v18 = vsel %vm111_vm0, %v81_v16, 0.0  ;;  %v34_v20 = vld [vmem:[%s2299_s0 + $0x98] sm:$0xff] }
   0x4   :  { %161 = vadd.xlane.f32.xlu0 %v160_v4  ;;  %v115_v10 = vsel %vm111_vm0, %v16_v8, 0.0  ;;  %v112_v11 = vsel %vm111_vm0, %v15_v9, 0.0  ;;  %v63_v12 = vld [vmem:[%s2299_s0 + $0x180] sm:$0xff]  ;;  %v64_v17 = vld [vmem:[%s2299_s0 + $0x188] sm:$0xff]  ;;  %v17_v21 = vld [vmem:[%s2299_s0 + $0x10] sm:$0xff]  ;;  %v169_v22 = vsel %vm111_vm0, %v34_v20, 0.0 }
   0x5   :  { %v256_v14 = vsel %vm111_vm0, %v63_v12, 0.0  ;;  %v259_v19 = vsel %vm111_vm0, %v64_v17, 0.0  ;;  %v118_v23 = vsel %vm111_vm0, %v17_v21, 0.0  ;;  %v82_v24 = vld [vmem:[%s2299_s0 + $0x218] sm:$0xff]  ;;  %v65_v25 = vld [vmem:[%s2299_s0 + $0x190] sm:$0xff]  ;;  %v35_v28 = vld [vmem:[%s2299_s0 + $0xa0] sm:$0xff] }
   0x6   :  { %v313_v26 = vsel %vm111_vm0, %v82_v24, 0.0  ;;  %v262_v27 = vsel %vm111_vm0, %v65_v25, 0.0  ;;  %v18_v29 = vld [vmem:[%s2299_s0 + $0x18] sm:$0xff]  ;;  %v172_v30 = vsel %vm111_vm0, %v35_v28, 0.0 }
   0x7   :  { %308 = vadd.xlane.f32.xlu1 %v307_v6  ;;  %v121_v31 = vsel %vm111_vm0, %v18_v29, 0.0 }
   0x8   :  { %164 = vadd.xlane.f32.xlu0 %v163_v7 }
   0xb   :  { %116 = vadd.xlane.f32.xlu1 %v115_v10 }
   0xc   :  { %113 = vadd.xlane.f32.xlu0 %v112_v11 }
   0xf   :  { %257 = vadd.xlane.f32.xlu1 %v256_v14 }
  0x10   :  { %167 = vadd.xlane.f32.xlu0 %v166_v15 }
  0x13   :  { %311 = vadd.xlane.f32.xlu1 %v310_v18 }
  0x14   :  { %260 = vadd.xlane.f32.xlu0 %v259_v19 }
  0x17   :  { %170 = vadd.xlane.f32.xlu1 %v169_v22 }
  0x18   :  { %119 = vadd.xlane.f32.xlu0 %v118_v23 }
  0x1b   :  { %314 = vadd.xlane.f32.xlu1 %v313_v26 }
  0x1c   :  { %263 = vadd.xlane.f32.xlu0 %v262_v27 }
  0x1d   :  { %8 = vsyncpa [#allocation3], 0  ;;  %v83_v32 = vld [vmem:[%s2299_s0 + $0x220] sm:$0xff]  ;;  %v66_v33 = vld [vmem:[%s2299_s0 + $0x198] sm:$0xff]  ;;  %vm562_vm1 = vcmask 130112   ;;  %vm569_vm2 = vcmask 195712  }
  0x1e   :  { %v316_v34 = vsel %vm111_vm0, %v83_v32, 0.0  ;;  %v265_v35 = vsel %vm111_vm0, %v66_v33, 0.0  ;;  %v36_v36 = vld [vmem:[%s2299_s0 + $0xa8] sm:$0xff]  ;;  %v19_v37 = vld [vmem:[%s2299_s0 + $0x20] sm:$0xff]  ;;  %v37_v44 = vld [vmem:[%s2299_s0 + $0xb0] sm:$0xff]  ;;  %vm576_vm3 = vcmask 261312  }
  0x1f   :  { %173 = vadd.xlane.f32.xlu1 %v172_v30  ;;  %v175_v38 = vsel %vm111_vm0, %v36_v36, 0.0  ;;  %v124_v39 = vsel %vm111_vm0, %v19_v37, 0.0  ;;  %v84_v40 = vld [vmem:[%s2299_s0 + $0x228] sm:$0xff]  ;;  %v67_v41 = vld [vmem:[%s2299_s0 + $0x1a0] sm:$0xff]  ;;  %v178_v46 = vsel %vm111_vm0, %v37_v44, 0.0  ;;  %v85_v48 = vld [vmem:[%s2299_s0 + $0x230] sm:$0xff] }
  0x20   :  { %122 = vadd.xlane.f32.xlu0 %v121_v31  ;;  %v319_v42 = vsel %vm111_vm0, %v84_v40, 0.0  ;;  %v268_v43 = vsel %vm111_vm0, %v67_v41, 0.0  ;;  %v20_v45 = vld [vmem:[%s2299_s0 + $0x28] sm:$0xff]  ;;  %v322_v50 = vsel %vm111_vm0, %v85_v48, 0.0  ;;  %v38_v52 = vld [vmem:[%s2299_s0 + $0xb8] sm:$0xff]  ;;  %v21_v53 = vld [vmem:[%s2299_s0 + $0x30] sm:$0xff] }
  0x21   :  { %v127_v47 = vsel %vm111_vm0, %v20_v45, 0.0  ;;  %v68_v49 = vld [vmem:[%s2299_s0 + $0x1a8] sm:$0xff]  ;;  %v181_v54 = vsel %vm111_vm0, %v38_v52, 0.0  ;;  %v130_v55 = vsel %vm111_vm0, %v21_v53, 0.0  ;;  %v47_v57 = vld [vmem:[%s2299_s0 + $0x100] sm:$0xff]  ;;  %v86_v60 = vld [vmem:[%s2299_s0 + $0x238] sm:$0xff] }
  0x22   :  { %v271_v51 = vsel %vm111_vm0, %v68_v49, 0.0  ;;  %v48_v56 = vld [vmem:[%s2299_s0 + $0x108] sm:$0xff]  ;;  %v208_v59 = vsel %vm111_vm0, %v47_v57, 0.0  ;;  %v69_v61 = vld [vmem:[%s2299_s0 + $0x1b0] sm:$0xff]  ;;  %v325_v62 = vsel %vm111_vm0, %v86_v60, 0.0  ;;  %v95_v1 = vld [vmem:[%s2299_s0 + $0x280] sm:$0xff] }
  0x23   :  { %317 = vadd.xlane.f32.xlu1 %v316_v34  ;;  %v211_v58 = vsel %vm111_vm0, %v48_v56, 0.0  ;;  %v274_v63 = vsel %vm111_vm0, %v69_v61, 0.0  ;;  %v96_v0 = vld [vmem:[%s2299_s0 + $0x288] sm:$0xff]  ;;  %v352_v3 = vsel %vm111_vm0, %v95_v1, 0.0  ;;  %v39_v4 = vld [vmem:[%s2299_s0 + $0xc0] sm:$0xff]  ;;  %v22_v5 = vld [vmem:[%s2299_s0 + $0x38] sm:$0xff] }
  0x24   :  { %266 = vadd.xlane.f32.xlu0 %v265_v35  ;;  %v355_v2 = vsel %vm111_vm0, %v96_v0, 0.0  ;;  %v184_v6 = vsel %vm111_vm0, %v39_v4, 0.0  ;;  %v133_v7 = vsel %vm111_vm0, %v22_v5, 0.0  ;;  %v70_v8 = vld [vmem:[%s2299_s0 + $0x1b8] sm:$0xff]  ;;  %v49_v9 = vld [vmem:[%s2299_s0 + $0x110] sm:$0xff]  ;;  %v87_v13 = vld [vmem:[%s2299_s0 + $0x240] sm:$0xff] }
  0x25   :  { %v277_v10 = vsel %vm111_vm0, %v70_v8, 0.0  ;;  %v214_v11 = vsel %vm111_vm0, %v49_v9, 0.0  ;;  %v97_v12 = vld [vmem:[%s2299_s0 + $0x290] sm:$0xff]  ;;  %v328_v15 = vsel %vm111_vm0, %v87_v13, 0.0  ;;  %v40_v16 = vld [vmem:[%s2299_s0 + $0xc8] sm:$0xff]  ;;  %v23_v17 = vld [vmem:[%s2299_s0 + $0x40] sm:$0xff] }
  0x26   :  { %v358_v14 = vsel %vm111_vm0, %v97_v12, 0.0  ;;  %v187_v18 = vsel %vm111_vm0, %v40_v16, 0.0  ;;  %v136_v19 = vsel %vm111_vm0, %v23_v17, 0.0  ;;  %v71_v20 = vld [vmem:[%s2299_s0 + $0x1c0] sm:$0xff]  ;;  %v50_v21 = vld [vmem:[%s2299_s0 + $0x118] sm:$0xff]  ;;  %v88_v25 = vld [vmem:[%s2299_s0 + $0x248] sm:$0xff] }
  0x27   :  { %176 = vadd.xlane.f32.xlu1 %v175_v38  ;;  %v280_v22 = vsel %vm111_vm0, %v71_v20, 0.0  ;;  %v217_v23 = vsel %vm111_vm0, %v50_v21, 0.0  ;;  %v98_v24 = vld [vmem:[%s2299_s0 + $0x298] sm:$0xff]  ;;  %v331_v27 = vsel %vm111_vm0, %v88_v25, 0.0  ;;  %v41_v28 = vld [vmem:[%s2299_s0 + $0xd0] sm:$0xff]  ;;  %v24_v29 = vld [vmem:[%s2299_s0 + $0x48] sm:$0xff] }
  0x28   :  { %125 = vadd.xlane.f32.xlu0 %v124_v39  ;;  %v361_v26 = vsel %vm111_vm0, %v98_v24, 0.0  ;;  %v190_v30 = vsel %vm111_vm0, %v41_v28, 0.0  ;;  %v139_v31 = vsel %vm111_vm0, %v24_v29, 0.0  ;;  %v72_v32 = vld [vmem:[%s2299_s0 + $0x1c8] sm:$0xff]  ;;  %v51_v33 = vld [vmem:[%s2299_s0 + $0x120] sm:$0xff]  ;;  %v89_v37 = vld [vmem:[%s2299_s0 + $0x250] sm:$0xff] }
  0x29   :  { %v283_v34 = vsel %vm111_vm0, %v72_v32, 0.0  ;;  %v220_v35 = vsel %vm111_vm0, %v51_v33, 0.0  ;;  %v99_v36 = vld [vmem:[%s2299_s0 + $0x2a0] sm:$0xff]  ;;  %v334_v39 = vsel %vm111_vm0, %v89_v37, 0.0  ;;  %v42_v40 = vld [vmem:[%s2299_s0 + $0xd8] sm:$0xff]  ;;  %v25_v41 = vld [vmem:[%s2299_s0 + $0x50] sm:$0xff] }
  0x2a   :  { %v364_v38 = vsel %vm111_vm0, %v99_v36, 0.0  ;;  %v73_v44 = vld [vmem:[%s2299_s0 + $0x1d0] sm:$0xff]  ;;  %v52_v45 = vld [vmem:[%s2299_s0 + $0x128] sm:$0xff]  ;;  %v90_v49 = vld [vmem:[%s2299_s0 + $0x258] sm:$0xff]  ;;  %vm583_vm4 = vcmask 326912   ;;  %vm590_vm5 = vcmask 392512  }
  0x2b   :  { %320 = vadd.xlane.f32.xlu1 %v319_v42  ;;  %v193_v42 = vsel %vm111_vm0, %v42_v40, 0.0  ;;  %v100_v48 = vld [vmem:[%s2299_s0 + $0x2a8] sm:$0xff]  ;;  %v43_v52 = vld [vmem:[%s2299_s0 + $0xe0] sm:$0xff]  ;;  %v26_v53 = vld [vmem:[%s2299_s0 + $0x58] sm:$0xff]  ;;  %vm597_vm6 = vcmask 458112   ;;  %vm604_vm7 = vcmask 523712  }
  0x2c   :  { %269 = vadd.xlane.f32.xlu0 %v268_v43  ;;  %v142_v43 = vsel %vm111_vm0, %v25_v41, 0.0  ;;  %v74_v56 = vld [vmem:[%s2299_s0 + $0x1d8] sm:$0xff]  ;;  %v53_v57 = vld [vmem:[%s2299_s0 + $0x130] sm:$0xff]  ;;  %v91_v61 = vld [vmem:[%s2299_s0 + $0x260] sm:$0xff]  ;;  %vm1393_vm8 = vmmov 0   ;;  %vm611_vm9 = vcmask 589312  }
  0x2d   :  { %v101_v60 = vld [vmem:[%s2299_s0 + $0x2b0] sm:$0xff]  ;;  %v44_v0 = vld [vmem:[%s2299_s0 + $0xe8] sm:$0xff]  ;;  %v27_v1 = vld [vmem:[%s2299_s0 + $0x60] sm:$0xff]  ;;  %vm618_vm10 = vcmask 654912   ;;  %vm625_vm11 = vcmask 720512   ;;  %vm632_vm12 = vcmask 786112  }
  0x2e   :  { %v75_v4 = vld [vmem:[%s2299_s0 + $0x1e0] sm:$0xff]  ;;  %v54_v5 = vld [vmem:[%s2299_s0 + $0x138] sm:$0xff]  ;;  %v92_v9 = vld [vmem:[%s2299_s0 + $0x268] sm:$0xff]  ;;  %vm639_vm13 = vcmask 851712   ;;  %vm646_vm14 = vcmask 917312   ;;  %vm653_vm15 = vcmask 982912  }
  0x2f   :  { %179 = vadd.xlane.f32.xlu1 %v178_v46  ;;  %v286_v46 = vsel %vm111_vm0, %v73_v44, 0.0  ;;  %v102_v8 = vld [vmem:[%s2299_s0 + $0x2b8] sm:$0xff]  ;;  %v343_v12 = vsel %vm111_vm0, %v92_v9, 0.0  ;;  %v45_v13 = vld [vmem:[%s2299_s0 + $0xf0] sm:$0xff]  ;;  %v55_v20 = vld [vmem:[%s2299_s0 + $0x140] sm:$0xff]  ;;  %s1395_s30 = smov [#allocation2]  }
  0x30   :  { %128 = vadd.xlane.f32.xlu0 %v127_v47  ;;  %v223_v47 = vsel %vm111_vm0, %v52_v45, 0.0  ;;  %v202_v16 = vsel %vm111_vm0, %v45_v13, 0.0  ;;  %v232_v25 = vsel %vm111_vm0, %v55_v20, 0.0  ;;  %v103_v28 = vld [vmem:[%s2299_s0 + $0x2c0] sm:$0xff]  ;;  %v93_v29 = vld [vmem:[%s2299_s0 + $0x270] sm:$0xff]  ;;  %s1212_s4 = sshll.u32 %s1395_s30, 4  ;;  %s1213_s4 = int_to_ptr.vmem [resolvable:$true] %s1212_s4 }
  0x31   :  { %v376_v32 = vsel %vm111_vm0, %v103_v28, 0.0  ;;  %v346_v33 = vsel %vm111_vm0, %v93_v29, 0.0  ;;  %v29_v40 = vld [vmem:[%s2299_s0 + $0x70] sm:$0xff]  ;;  %v404_v29 = vld [vmem:[%s2300_s1 + $0x20] sm:$0xff]  ;;  %s1368_s5 = scalar_lea.vmem %s1213_s4, 32  ;;  %p1373_p1 = scmp.lt.s32.totalorder %s1213_s4, %s1213_s4 }
  0x32   :  { %v57_v20 = vld [vmem:[%s2299_s0 + $0x150] sm:$0xff]  ;;  %p1369_p0 = scmp.ne.s32.totalorder %s1213_s4, %s1368_s5  ;;  %p1374_p2 = scmp.lt.s32.totalorder %s1368_s5, %s1368_s5 }
  0x33   :  { %323 = vadd.xlane.f32.xlu1 %v322_v50  ;;  %v367_v50 = vsel %vm111_vm0, %v100_v48, 0.0 }
  0x34   :  { %272 = vadd.xlane.f32.xlu0 %v271_v51  ;;  %v337_v51 = vsel %vm111_vm0, %v90_v49, 0.0  ;;  %p1375_p3 = por %p1374_p2, %p1373_p1 }
  0x36   :  { %p1376_p4 = pnand %p1375_p3, %p1369_p0 }
  0x37   :  { %182 = vadd.xlane.f32.xlu1 %v181_v54  ;;  %v196_v54 = vsel %vm111_vm0, %v43_v52, 0.0  ;;  %v416_v52 = vld [vmem:[%s2300_s1 + $0x80] sm:$0xff] }
  0x38   :  { %131 = vadd.xlane.f32.xlu0 %v130_v55  ;;  %v145_v55 = vsel %vm111_vm0, %v26_v53, 0.0  ;;  %v417_v53 = vld [vmem:[%s2300_s1 + $0x88] sm:$0xff] }
  0x3b   :  { %212 = vadd.xlane.f32.xlu1 %v211_v58  ;;  %v289_v58 = vsel %vm111_vm0, %v74_v56, 0.0  ;;  %v400_v56 = vld [vmem:[%s2300_s1] sm:$0xff] }
  0x3c   :  { %209 = vadd.xlane.f32.xlu0 %v208_v59  ;;  %v226_v59 = vsel %vm111_vm0, %v53_v57, 0.0  ;;  %v401_v57 = vld [vmem:[%s2300_s1 + $0x8] sm:$0xff] }
  0x3f   :  { %326 = vadd.xlane.f32.xlu1 %v325_v62  ;;  %v370_v62 = vsel %vm111_vm0, %v101_v60, 0.0 }
  0x40   :  { %275 = vadd.xlane.f32.xlu0 %v274_v63  ;;  %v340_v63 = vsel %vm111_vm0, %v91_v61, 0.0 }
  0x43   :  { %356 = vadd.xlane.f32.xlu1 %v355_v2  ;;  %v199_v2 = vsel %vm111_vm0, %v44_v0, 0.0  ;;  %v104_v0 = vld [vmem:[%s2299_s0 + $0x2c8] sm:$0xff] }
  0x44   :  { %353 = vadd.xlane.f32.xlu0 %v352_v3  ;;  %v148_v3 = vsel %vm111_vm0, %v27_v1, 0.0  ;;  %v94_v1 = vld [vmem:[%s2299_s0 + $0x278] sm:$0xff] }
  0x47   :  { %185 = vadd.xlane.f32.xlu1 %v184_v6  ;;  %v292_v6 = vsel %vm111_vm0, %v75_v4, 0.0  ;;  %v419_v4 = vld [vmem:[%s2300_s1 + $0x98] sm:$0xff] }
  0x48   :  { %134 = vadd.xlane.f32.xlu0 %v133_v7  ;;  %v229_v7 = vsel %vm111_vm0, %v54_v5, 0.0 }
  0x4b   :  { %278 = vadd.xlane.f32.xlu1 %v277_v10  ;;  %v551_v10 = vlaneseq }
  0x4c   :  { %215 = vadd.xlane.f32.xlu0 %v214_v11  ;;  %v373_v11 = vsel %vm111_vm0, %v102_v8, 0.0  ;;  %v403_v8 = vld [vmem:[%s2300_s1 + $0x18] sm:$0xff] }
  0x4f   :  { %359 = vadd.xlane.f32.xlu1 %v358_v14  ;;  %v28_v14 = vld [vmem:[%s2299_s0 + $0x68] sm:$0xff] }
  0x50   :  { %329 = vadd.xlane.f32.xlu0 %v328_v15  ;;  %v1702_v15 = vand.u32 127, %v551_v10  ;;  %v151_v17 = vsel %vm111_vm0, %v28_v14, 0.0 }
  0x52   :  { %v557_v21 = vadd.s32 4294967288, %v1702_v15 }
  0x53   :  { %188 = vadd.xlane.f32.xlu1 %v187_v18  ;;  %v1706_v18 = vshrl.u32 %v551_v10, 7 }
  0x54   :  { %137 = vadd.xlane.f32.xlu0 %v136_v19  ;;  %v76_v19 = vld [vmem:[%s2299_s0 + $0x1e8] sm:$0xff] }
  0x55   :  { %v295_v24 = vsel %vm111_vm0, %v76_v19, 0.0 }
  0x57   :  { %281 = vadd.xlane.f32.xlu1 %v280_v22 }
  0x58   :  { %218 = vadd.xlane.f32.xlu0 %v217_v23 }
  0x5b   :  { %362 = vadd.xlane.f32.xlu1 %v361_v26  ;;  %v1719_v26 = vsub.s32 %v1702_v15, %v1706_v18 }
  0x5c   :  { %332 = vadd.xlane.f32.xlu0 %v331_v27  ;;  %v1722_v27 = vsub.s32 %v557_v21, %v1706_v18  ;;  %v30_v21 = vld [vmem:[%s2299_s0 + $0x78] sm:$0xff] }
  0x5f   :  { %191 = vadd.xlane.f32.xlu1 %v190_v30 }
  0x60   :  { %140 = vadd.xlane.f32.xlu0 %v139_v31 }
  0x63   :  { %284 = vadd.xlane.f32.xlu1 %v283_v34  ;;  %v564_v34 = vadd.s32 4294967280, %v1702_v15 }
  0x64   :  { %221 = vadd.xlane.f32.xlu0 %v220_v35 }
  0x65   :  { %v1750_v49 = vsub.s32 %v564_v34, %v1706_v18  ;;  %v157_v34 = vsel %vm111_vm0, %v30_v21, 0.0  ;;  %v410_v21 = vld [vmem:[%s2300_s1 + $0x50] sm:$0xff] }
  0x67   :  { %365 = vadd.xlane.f32.xlu1 %v364_v38 }
  0x68   :  { %335 = vadd.xlane.f32.xlu0 %v334_v39  ;;  %v46_v39 = vld [vmem:[%s2299_s0 + $0xf8] sm:$0xff] }
  0x69   :  { %v205_v45 = vsel %vm111_vm0, %v46_v39, 0.0  ;;  %v78_v39 = vld [vmem:[%s2299_s0 + $0x1f8] sm:$0xff] }
  0x6b   :  { %194 = vadd.xlane.f32.xlu1 %v193_v42 }
  0x6c   :  { %143 = vadd.xlane.f32.xlu0 %v142_v43 }
  0x6f   :  { %287 = vadd.xlane.f32.xlu1 %v286_v46  ;;  %v154_v46 = vsel %vm111_vm0, %v29_v40, 0.0  ;;  %v578_v40 = vadd.s32 4294967264, %v1702_v15 }
  0x70   :  { %224 = vadd.xlane.f32.xlu0 %v223_v47 }
  0x73   :  { %368 = vadd.xlane.f32.xlu1 %v367_v50  ;;  %v77_v50 = vld [vmem:[%s2299_s0 + $0x1f0] sm:$0xff] }
  0x74   :  { %338 = vadd.xlane.f32.xlu0 %v337_v51  ;;  %v56_v51 = vld [vmem:[%s2299_s0 + $0x148] sm:$0xff]  ;;  %v298_v60 = vsel %vm111_vm0, %v77_v50, 0.0 }
  0x75   :  { %v235_v61 = vsel %vm111_vm0, %v56_v51, 0.0  ;;  %v301_v51 = vsel %vm111_vm0, %v78_v39, 0.0  ;;  %v429_v39 = vld [vmem:[%s2300_s1 + $0xe8] sm:$0xff] }
  0x77   :  { %197 = vadd.xlane.f32.xlu1 %v196_v54 }
  0x78   :  { %146 = vadd.xlane.f32.xlu0 %v145_v55  ;;  %v1308_v55 = vpack.c.bf16 %v417_v53, %v416_v52 }
  0x7a   :  { %1309 = vmatprep.subr.bf16.mxu0 %v1308_v55 }
  0x7b   :  { %290 = vadd.xlane.f32.xlu1 %v289_v58 }
  0x7c   :  { %227 = vadd.xlane.f32.xlu0 %v226_v59 }
  0x7f   :  { %371 = vadd.xlane.f32.xlu1 %v370_v62  ;;  %v1310_v62 = vpack.c.bf16 %v401_v57, %v400_v56  ;;  %v1855_v56 = vsub.s32 %v578_v40, %v1706_v18  ;;  %v106_v57 = vld [vmem:[%s2299_s0 + $0x2d8] sm:$0xff] }
  0x80   :  { %341 = vadd.xlane.f32.xlu0 %v340_v63 }
  0x81   :  { %1311 = vmatpush3.bf16.msra.mxu0 %v1310_v62 }
  0x83   :  { %200 = vadd.xlane.f32.xlu1 %v199_v2  ;;  %v571_v2 = vadd.s32 4294967272, %v1702_v15 }
  0x84   :  { %149 = vadd.xlane.f32.xlu0 %v148_v3  ;;  %v418_v3 = vld [vmem:[%s2300_s1 + $0x90] sm:$0xff] }
  0x85   :  { %v1802_v19 = vsub.s32 %v571_v2, %v1706_v18 }
  0x87   :  { %293 = vadd.xlane.f32.xlu1 %v292_v6  ;;  %v1312_v6 = vpack.c.bf16 %v419_v4, %v418_v3  ;;  %v385_v4 = vsel %vm111_vm0, %v106_v57, 0.0  ;;  %v109_v57 = vld [vmem:[%s2299_s0 + $0x2f0] sm:$0xff] }
  0x88   :  { %230 = vadd.xlane.f32.xlu0 %v229_v7  ;;  %v402_v7 = vld [vmem:[%s2300_s1 + $0x10] sm:$0xff] }
  0x89   :  { %v1314_v13 = vpack.c.bf16 %v403_v8, %v402_v7  ;;  %1313 = vmatprep.subr.bf16.mxu0 %v1312_v6  ;;  %v107_v6 = vld [vmem:[%s2299_s0 + $0x2e0] sm:$0xff]  ;;  %v585_v7 = vadd.s32 4294967256, %v1702_v15 }
  0x8b   :  { %374 = vadd.xlane.f32.xlu1 %v373_v11  ;;  %v379_v11 = vsel %vm111_vm0, %v104_v0, 0.0  ;;  %1315 = vmatpush3.bf16.msra.mxu0 %v1314_v13  ;;  %v408_v0 = vld [vmem:[%s2300_s1 + $0x40] sm:$0xff]  ;;  %v427_v13 = vld [vmem:[%s2300_s1 + $0xd8] sm:$0xff] }
  0x8c   :  { %344 = vadd.xlane.f32.xlu0 %v343_v12  ;;  %v349_v12 = vsel %vm111_vm0, %v94_v1, 0.0  ;;  %v409_v1 = vld [vmem:[%s2300_s1 + $0x48] sm:$0xff] }
  0x8d   :  { %v1326_v8 = vpack.c.bf16 %v409_v1, %v408_v0  ;;  %v414_v1 = vld [vmem:[%s2300_s1 + $0x70] sm:$0xff] }
  0x8f   :  { %203 = vadd.xlane.f32.xlu1 %v202_v16 }
  0x90   :  { %152 = vadd.xlane.f32.xlu0 %v151_v17  ;;  %v306_v22 = vpop.xlane.xlu1 %305 }
  0x91   :  { %v162_v23 = vpop.xlane.xlu0 %161  ;;  %v902_v35 = vrot.slane %v306_v22, %v1719_v26  ;;  %v420_v22 = vld [vmem:[%s2300_s1 + $0xa0] sm:$0xff] }
  0x92   :  { %v665_v36 = vrot.slane %v162_v23, %v1719_v26  ;;  %v421_v23 = vld [vmem:[%s2300_s1 + $0xa8] sm:$0xff] }
  0x93   :  { %296 = vadd.xlane.f32.xlu1 %v295_v24  ;;  %v1316_v28 = vpack.c.bf16 %v421_v23, %v420_v22  ;;  %v411_v22 = vld [vmem:[%s2300_s1 + $0x58] sm:$0xff]  ;;  %v432_v23 = vld [vmem:[%s2300_s1 + $0x100] sm:$0xff] }
  0x94   :  { %233 = vadd.xlane.f32.xlu0 %v232_v25  ;;  %v309_v30 = vpop.xlane.xlu1 %308 }
  0x95   :  { %v165_v31 = vpop.xlane.xlu0 %164  ;;  %v906_v37 = vrot.slane %v309_v30, %v1722_v27  ;;  %v405_v30 = vld [vmem:[%s2300_s1 + $0x28] sm:$0xff]  ;;  %1317 = vmatprep.subr.bf16.mxu0 %v1316_v28 }
  0x96   :  { %v669_v38 = vrot.slane %v165_v31, %v1722_v27 }
  0x97   :  { %v907_v41 = vsel %vm562_vm1, %v906_v37, %v902_v35  ;;  %377 = vadd.xlane.f32.xlu1 %v376_v32  ;;  %v1318_v35 = vpack.c.bf16 %v405_v30, %v404_v29  ;;  %v1908_v29 = vsub.s32 %v585_v7, %v1706_v18  ;;  %v1330_v30 = vpack.c.bf16 %v411_v22, %v410_v21  ;;  %v438_v21 = vld [vmem:[%s2300_s1 + $0x130] sm:$0xff]  ;;  %v439_v22 = vld [vmem:[%s2300_s1 + $0x138] sm:$0xff] }
  0x98   :  { %v670_v42 = vsel %vm562_vm1, %v669_v38, %v665_v36  ;;  %347 = vadd.xlane.f32.xlu0 %v346_v33  ;;  %v117_v43 = vpop.xlane.xlu1 %116  ;;  %v238_v33 = vsel %vm111_vm0, %v57_v20, 0.0  ;;  %v105_v38 = vld [vmem:[%s2299_s0 + $0x2d0] sm:$0xff] }
  0x99   :  { %v114_v44 = vpop.xlane.xlu0 %113  ;;  %v561_v47 = vrot.slane %v117_v43, %v1722_v27  ;;  %1319 = vmatpush3.bf16.msra.mxu0 %v1318_v35  ;;  %v382_v50 = vsel %vm111_vm0, %v105_v38, 0.0  ;;  %v60_v35 = vld [vmem:[%s2299_s0 + $0x168] sm:$0xff]  ;;  %v428_v38 = vld [vmem:[%s2300_s1 + $0xe0] sm:$0xff] }
  0x9a   :  { %v556_v48 = vrot.slane %v114_v44, %v1719_v26 }
  0x9b   :  { %206 = vadd.xlane.f32.xlu1 %v205_v45  ;;  %v406_v45 = vld [vmem:[%s2300_s1 + $0x30] sm:$0xff] }
  0x9c   :  { %v1765_v54 = vsel %vm562_vm1, %v561_v47, %v556_v48  ;;  %155 = vadd.xlane.f32.xlu0 %v154_v46  ;;  %v258_v58 = vpop.xlane.xlu1 %257  ;;  %v407_v46 = vld [vmem:[%s2300_s1 + $0x38] sm:$0xff] }
  0x9d   :  { %v168_v59 = vpop.xlane.xlu0 %167  ;;  %v823_v14 = vrot.slane %v258_v58, %v1719_v26  ;;  %v1322_v53 = vpack.c.bf16 %v407_v46, %v406_v45  ;;  %v58_v58 = vld [vmem:[%s2299_s0 + $0x158] sm:$0xff]  ;;  %v434_v45 = vld [vmem:[%s2300_s1 + $0x110] sm:$0xff] }
  0x9e   :  { %v674_v63 = vrot.slane %v168_v59, %v1750_v49  ;;  %v424_v59 = vld [vmem:[%s2300_s1 + $0xc0] sm:$0xff] }
  0x9f   :  { %299 = vadd.xlane.f32.xlu1 %v298_v60  ;;  %v425_v60 = vld [vmem:[%s2300_s1 + $0xc8] sm:$0xff] }
  0xa0   :  { %v675_v5 = vsel %vm569_vm2, %v674_v63, %v670_v42  ;;  %236 = vadd.xlane.f32.xlu0 %v235_v61  ;;  %v312_v9 = vpop.xlane.xlu1 %311  ;;  %v423_v42 = vld [vmem:[%s2300_s1 + $0xb8] sm:$0xff]  ;;  %v1324_v63 = vpack.c.bf16 %v425_v60, %v424_v59  ;;  %v430_v60 = vld [vmem:[%s2300_s1 + $0xf0] sm:$0xff] }
  0xa1   :  { %v261_v10 = vpop.xlane.xlu0 %260  ;;  %v911_v16 = vrot.slane %v312_v9, %v1750_v49 }
  0xa2   :  { %v827_v17 = vrot.slane %v261_v10, %v1722_v27 }
  0xa3   :  { %v912_v24 = vsel %vm569_vm2, %v911_v16, %v907_v41  ;;  %380 = vadd.xlane.f32.xlu1 %v379_v11  ;;  %v422_v41 = vld [vmem:[%s2300_s1 + $0xb0] sm:$0xff]  ;;  %v59_v11 = vld [vmem:[%s2299_s0 + $0x160] sm:$0xff] }
  0xa4   :  { %v828_v25 = vsel %vm562_vm1, %v827_v17, %v823_v14  ;;  %350 = vadd.xlane.f32.xlu0 %v349_v12  ;;  %v171_v31 = vpop.xlane.xlu1 %170  ;;  %v1320_v52 = vpack.c.bf16 %v423_v42, %v422_v41  ;;  %v426_v12 = vld [vmem:[%s2300_s1 + $0xd0] sm:$0xff]  ;;  %v388_v17 = vsel %vm111_vm0, %v107_v6, 0.0  ;;  %v244_v28 = vsel %vm111_vm0, %v59_v11, 0.0 }
  0xa5   :  { %v120_v32 = vpop.xlane.xlu0 %119  ;;  %v679_v36 = vrot.slane %v171_v31, %v1802_v19  ;;  %v1328_v20 = vpack.c.bf16 %v427_v13, %v426_v12  ;;  %v433_v31 = vld [vmem:[%s2300_s1 + $0x108] sm:$0xff]  ;;  %v1332_v42 = vpack.c.bf16 %v429_v39, %v428_v38  ;;  %v394_v6 = vsel %vm111_vm0, %v109_v57, 0.0  ;;  %v110_v13 = vld [vmem:[%s2299_s0 + $0x2f8] sm:$0xff] }
  0xa6   :  { %v568_v37 = vrot.slane %v120_v32, %v1750_v49  ;;  %1321 = vmatprep.subr.bf16.mxu0 %v1320_v52  ;;  %v441_v38 = vld [vmem:[%s2300_s1 + $0x148] sm:$0xff] }
  0xa7   :  { %v680_v43 = vsel %vm576_vm3, %v679_v36, %v675_v5  ;;  %239 = vadd.xlane.f32.xlu1 %v238_v33  ;;  %v241_v5 = vsel %vm111_vm0, %v58_v58, 0.0  ;;  %1323 = vmatpush3.bf16.msra.mxu0 %v1322_v53  ;;  %v1392_v36 = vmov 0.0|0.0   ;;  %v435_v53 = vld [vmem:[%s2300_s1 + $0x118] sm:$0xff]  ;;  %v61_v58 = vld [vmem:[%s2299_s0 + $0x170] sm:$0xff] }
  0xa8   :  { %v570_v44 = vsel %vm569_vm2, %v568_v37, %v1765_v54  ;;  %158 = vadd.xlane.f32.xlu0 %v157_v34  ;;  %v315_v47 = vpop.xlane.xlu1 %314  ;;  %1325 = vmatprep.subr.bf16.mxu0 %v1324_v63  ;;  %v108_v34 = vld [vmem:[%s2299_s0 + $0x2e8] sm:$0xff]  ;;  %v1341_v37 = vpack.c.bf16 %v433_v31, %v432_v23  ;;  %v1344_v59 = vpack.c.bf16 %v435_v53, %v434_v45  ;;  %v250_v7 = vsel %vm111_vm0, %v61_v58, 0.0  ;;  %v444_v58 = vld [vmem:[%s2300_s1 + $0x160] sm:$0xff] }
  0xa9   :  { %v264_v48 = vpop.xlane.xlu0 %263  ;;  %v916_v54 = vrot.slane %v315_v47, %v1802_v19  ;;  %1340 = vmatprep.subr.bf16.mxu1 %v1392_v36 }
  0xaa   :  { %v832_v55 = vrot.slane %v264_v48, %v1750_v49  ;;  %v391_v48 = vsel %vm111_vm0, %v108_v34, 0.0  ;;  %1342 = vmatpush3.bf16.msra.mxu1 %v1341_v37  ;;  %v440_v37 = vld [vmem:[%s2300_s1 + $0x140] sm:$0xff] }
  0xab   :  { %v917_v61 = vsel %vm576_vm3, %v916_v54, %v912_v24  ;;  %383 = vadd.xlane.f32.xlu1 %v382_v50  ;;  %1327 = vmatpush3.bf16.msra.mxu0 %v1326_v8  ;;  %v247_v50 = vsel %vm111_vm0, %v60_v35, 0.0 }
  0xac   :  { %v833_v62 = vsel %vm569_vm2, %v832_v55, %v828_v25  ;;  %302 = vadd.xlane.f32.xlu0 %v301_v51  ;;  %v174_v2 = vpop.xlane.xlu1 %173  ;;  %1329 = vmatprep.subr.bf16.mxu0 %v1328_v20  ;;  %v592_v51 = vadd.s32 4294967248, %v1702_v15 }
  0xad   :  { %v123_v3 = vpop.xlane.xlu0 %122  ;;  %v684_v9 = vrot.slane %v174_v2, %v1855_v56  ;;  %1343 = vmatprep.subr.bf16.mxu1 %v1392_v36  ;;  %v415_v2 = vld [vmem:[%s2300_s1 + $0x78] sm:$0xff] }
  0xae   :  { %v575_v10 = vrot.slane %v123_v3, %v1802_v19  ;;  %v436_v3 = vld [vmem:[%s2300_s1 + $0x120] sm:$0xff]  ;;  %v1974_v8 = vsub.s32 %v592_v51, %v1706_v18  ;;  %1345 = vmatpush3.bf16.msra.mxu1 %v1344_v59  ;;  %v445_v59 = vld [vmem:[%s2300_s1 + $0x168] sm:$0xff] }
  0xaf   :  { %v685_v14 = vsel %vm583_vm4, %v684_v9, %v680_v43  ;;  %386 = vadd.xlane.f32.xlu1 %v385_v4  ;;  %v412_v43 = vld [vmem:[%s2300_s1 + $0x60] sm:$0xff]  ;;  %1331 = vmatpush3.bf16.msra.mxu0 %v1330_v30  ;;  %v1338_v9 = vpack.c.bf16 %v415_v2, %v414_v1  ;;  %v1350_v30 = vpack.c.bf16 %v439_v22, %v438_v21  ;;  %v446_v2 = vld [vmem:[%s2300_s1 + $0x170] sm:$0xff] }
  0xb0   :  { %v577_v16 = vsel %vm576_vm3, %v575_v10, %v570_v44  ;;  %242 = vadd.xlane.f32.xlu0 %v241_v5  ;;  %v318_v24 = vpop.xlane.xlu1 %317  ;;  %v413_v44 = vld [vmem:[%s2300_s1 + $0x68] sm:$0xff]  ;;  %1333 = vmatprep.subr.bf16.mxu0 %v1332_v42 }
  0xb1   :  { %v267_v25 = vpop.xlane.xlu0 %266  ;;  %v921_v32 = vrot.slane %v318_v24, %v1855_v56  ;;  %v1334_v52 = vpack.c.bf16 %v413_v44, %v412_v43  ;;  %v437_v10 = vld [vmem:[%s2300_s1 + $0x128] sm:$0xff]  ;;  %1346 = vmatprep.subr.bf16.mxu1 %v1392_v36 }
  0xb2   :  { %v837_v33 = vrot.slane %v267_v25, %v1802_v19  ;;  %v397_v25 = vsel %vm111_vm0, %v110_v13, 0.0 }
  0xb3   :  { %v922_v40 = vsel %vm583_vm4, %v921_v32, %v917_v61  ;;  %389 = vadd.xlane.f32.xlu1 %v388_v17  ;;  %v431_v61 = vld [vmem:[%s2300_s1 + $0xf8] sm:$0xff]  ;;  %1335 = vmatpush3.bf16.msra.mxu0 %v1334_v52 }
  0xb4   :  { %v838_v41 = vsel %vm576_vm3, %v837_v33, %v833_v62  ;;  %245 = vadd.xlane.f32.xlu0 %v244_v28  ;;  %v177_v46 = vpop.xlane.xlu1 %176  ;;  %v1336_v0 = vpack.c.bf16 %v431_v61, %v430_v60  ;;  %v599_v33 = vadd.s32 4294967240, %v1702_v15 }
  0xb5   :  { %v126_v47 = vpop.xlane.xlu0 %125  ;;  %v689_v54 = vrot.slane %v177_v46, %v1908_v29 }
  0xb6   :  { %v582_v55 = vrot.slane %v126_v47, %v1855_v56  ;;  %1337 = vmatprep.subr.bf16.mxu0 %v1336_v0  ;;  %v2013_v44 = vsub.s32 %v599_v33, %v1706_v18  ;;  %v442_v47 = vld [vmem:[%s2300_s1 + $0x150] sm:$0xff]  ;;  %v613_v33 = vadd.s32 4294967224, %v1702_v15 }
  0xb7   :  { %v690_v62 = vsel %vm590_vm5, %v689_v54, %v685_v14  ;;  %392 = vadd.xlane.f32.xlu1 %v391_v48  ;;  %v62_v14 = vld [vmem:[%s2299_s0 + $0x178] sm:$0xff]  ;;  %1339 = vmatpush3.bf16.msra.mxu0 %v1338_v9 }
  0xb8   :  { %v584_v63 = vsel %vm583_vm4, %v582_v55, %v577_v16  ;;  %248 = vadd.xlane.f32.xlu0 %v247_v50  ;;  %v321_v4 = vpop.xlane.xlu1 %320  ;;  %v1347_v16 = vpack.c.bf16 %v437_v10, %v436_v3  ;;  %v253_v28 = vsel %vm111_vm0, %v62_v14, 0.0  ;;  %v443_v48 = vld [vmem:[%s2300_s1 + $0x158] sm:$0xff]  ;;  %vm660_vm0 = vcmask 1048512  }
  0xb9   :  { %v270_v5 = vpop.xlane.xlu0 %269  ;;  %v926_v11 = vrot.slane %v321_v4, %v1908_v29  ;;  %v1356_v52 = vpack.c.bf16 %v443_v48, %v442_v47  ;;  %v447_v3 = vld [vmem:[%s2300_s1 + $0x178] sm:$0xff] }
  0xba   :  { %v842_v12 = vrot.slane %v270_v5, %v1855_v56  ;;  %1348 = vmatpush3.bf16.msra.mxu1 %v1347_v16 }
  0xbb   :  { %v927_v17 = vsel %vm590_vm5, %v926_v11, %v922_v40  ;;  %395 = vadd.xlane.f32.xlu1 %v394_v6  ;;  %1349 = vmatprep.subr.bf16.mxu1 %v1392_v36  ;;  %v606_v6 = vadd.s32 4294967232, %v1702_v15  ;;  %v1394_v11 = vmov 0.0  }
  0xbc   :  { %v843_v20 = vsel %vm583_vm4, %v842_v12, %v838_v41  ;;  %251 = vadd.xlane.f32.xlu0 %v250_v7  ;;  %v180_v23 = vpop.xlane.xlu1 %179  ;;  %v1353_v41 = vpack.c.bf16 %v441_v38, %v440_v37  ;;  %v1362_v7 = vpack.c.bf16 %v447_v3, %v446_v2  ;;  %1305 = vmatprep.mubr.msk.f32.mxu1 %vm1393_vm8, %v1394_v11 }
  0xbd   :  { %v129_v24 = vpop.xlane.xlu0 %128  ;;  %v694_v31 = vrot.slane %v180_v23, %v1974_v8  ;;  %v2054_v21 = vsub.s32 %v606_v6, %v1706_v18 }
  0xbe   :  { %v589_v32 = vrot.slane %v129_v24, %v1908_v29  ;;  %1351 = vmatpush3.bf16.msra.mxu1 %v1350_v30 }
  0xbf   :  { %v695_v34 = vsel %vm597_vm6, %v694_v31, %v690_v62  ;;  %398 = vadd.xlane.f32.xlu1 %v397_v25  ;;  %1352 = vmatprep.subr.bf16.mxu1 %v1392_v36  ;;  %v1359_v62 = vpack.c.bf16 %v445_v59, %v444_v58 }
  0xc0   :  { %v591_v35 = vsel %vm590_vm5, %v589_v32, %v584_v63  ;;  %254 = vadd.xlane.f32.xlu0 %v253_v28  ;;  %v324_v39 = vpop.xlane.xlu1 %323 }
  0xc1   :  { %v273_v40 = vpop.xlane.xlu0 %272  ;;  %v931_v42 = vrot.slane %v324_v39, %v1974_v8 }
  0xc2   :  { %v847_v43 = vrot.slane %v273_v40, %v1908_v29  ;;  %1354 = vmatpush3.bf16.msra.mxu1 %v1353_v41  ;;  %v2069_v41 = vsub.s32 %v613_v33, %v1706_v18 }
  0xc3   :  { %v932_v45 = vsel %vm597_vm6, %v931_v42, %v927_v17  ;;  %1355 = vmatprep.subr.bf16.mxu1 %v1392_v36 }
  0xc4   :  { %v848_v46 = vsel %vm590_vm5, %v847_v43, %v843_v20  ;;  %v183_v50 = vpop.xlane.xlu1 %182 }
  0xc5   :  { %v132_v51 = vpop.xlane.xlu0 %131  ;;  %v699_v53 = vrot.slane %v183_v50, %v2013_v44 }
  0xc6   :  { %v596_v54 = vrot.slane %v132_v51, %v1974_v8  ;;  %1357 = vmatpush3.bf16.msra.mxu1 %v1356_v52 }
  0xc7   :  { %v700_v55 = vsel %vm604_vm7, %v699_v53, %v695_v34  ;;  %1358 = vmatprep.subr.bf16.mxu1 %v1392_v36 }
  0xc8   :  { %v598_v57 = vsel %vm597_vm6, %v596_v54, %v591_v35  ;;  %v213_v60 = vpop.xlane.xlu1 %212 }
  0xc9   :  { %v210_v61 = vpop.xlane.xlu0 %209  ;;  %v748_v63 = vrot.slane %v213_v60, %v1722_v27 }
  0xca   :  { %v744_v0 = vrot.slane %v210_v61, %v1719_v26  ;;  %1360 = vmatpush3.bf16.msra.mxu1 %v1359_v62 }
  0xcb   :  { %1361 = vmatprep.subr.bf16.mxu1 %v1392_v36 }
  0xcc   :  { %v749_v1 = vsel %vm562_vm1, %v748_v63, %v744_v0  ;;  %v327_v4 = vpop.xlane.xlu1 %326 }
  0xcd   :  { %v276_v5 = vpop.xlane.xlu0 %275  ;;  %v936_v9 = vrot.slane %v327_v4, %v2013_v44 }
  0xce   :  { %v852_v10 = vrot.slane %v276_v5, %v1974_v8  ;;  %1363 = vmatpush3.bf16.msra.mxu1 %v1362_v7 }
  0xcf   :  { %v937_v12 = vsel %vm604_vm7, %v936_v9, %v932_v45 }
  0xd0   :  { %v853_v13 = vsel %vm597_vm6, %v852_v10, %v848_v46  ;;  %v357_v14 = vpop.xlane.xlu1 %356 }
  0xd1   :  { %v354_v16 = vpop.xlane.xlu0 %353  ;;  %v985_v17 = vrot.slane %v357_v14, %v1722_v27 }
  0xd2   :  { %v981_v20 = vrot.slane %v354_v16, %v1719_v26 }
  0xd4   :  { %v986_v22 = vsel %vm562_vm1, %v985_v17, %v981_v20  ;;  %v186_v36 = vpop.xlane.xlu1 %185  ;;  %vm1057_vm1 = vcmask 1041409  }
  0xd5   :  { %v135_v23 = vpop.xlane.xlu0 %134  ;;  %v704_v24 = vrot.slane %v186_v36, %v2054_v21 }
  0xd6   :  { %v603_v25 = vrot.slane %v135_v23, %v2013_v44 }
  0xd7   :  { %v705_v28 = vsel %vm611_vm9, %v704_v24, %v700_v55 }
  0xd8   :  { %v605_v30 = vsel %vm604_vm7, %v603_v25, %v598_v57  ;;  %v279_v31 = vpop.xlane.xlu1 %278 }
  0xd9   :  { %v216_v27 = vpop.xlane.xlu0 %215  ;;  %v857_v26 = vrot.slane %v279_v31, %v2013_v44 }
  0xda   :  { %v753_v32 = vrot.slane %v216_v27, %v1750_v49 }
  0xdb   :  { %v858_v34 = vsel %vm604_vm7, %v857_v26, %v853_v13 }
  0xdc   :  { %v754_v35 = vsel %vm569_vm2, %v753_v32, %v749_v1  ;;  %v360_v37 = vpop.xlane.xlu1 %359 }
  0xdd   :  { %v330_v38 = vpop.xlane.xlu0 %329  ;;  %v990_v39 = vrot.slane %v360_v37, %v1750_v49 }
  0xde   :  { %v941_v40 = vrot.slane %v330_v38, %v2054_v21 }
  0xdf   :  { %v991_v42 = vsel %vm569_vm2, %v990_v39, %v986_v22 }
  0xe0   :  { %v942_v43 = vsel %vm611_vm9, %v941_v40, %v937_v12  ;;  %v189_v45 = vpop.xlane.xlu1 %188 }
  0xe1   :  { %v138_v46 = vpop.xlane.xlu0 %137  ;;  %v709_v47 = vrot.slane %v189_v45, %v2069_v41  ;;  %v620_v45 = vadd.s32 4294967216, %v1702_v15 }
  0xe2   :  { %v610_v48 = vrot.slane %v138_v46, %v2054_v21  ;;  %v627_v46 = vadd.s32 4294967208, %v1702_v15 }
  0xe3   :  { %v2076_v50 = vsel %vm618_vm10, %v709_v47, %v705_v28  ;;  %v634_v47 = vadd.s32 4294967200, %v1702_v15 }
  0xe4   :  { %v612_v49 = vsel %vm611_vm9, %v610_v48, %v605_v30  ;;  %v282_v51 = vpop.xlane.xlu1 %281 }
  0xe5   :  { %v219_v52 = vpop.xlane.xlu0 %218  ;;  %v862_v53 = vrot.slane %v282_v51, %v2054_v21  ;;  %v641_v51 = vadd.s32 4294967192, %v1702_v15 }
  0xe6   :  { %v758_v54 = vrot.slane %v219_v52, %v1802_v19  ;;  %v2144_v52 = vsub.s32 %v620_v45, %v1706_v18 }
  0xe7   :  { %v863_v55 = vsel %vm611_vm9, %v862_v53, %v858_v34  ;;  %v648_v53 = vadd.s32 4294967184, %v1702_v15 }
  0xe8   :  { %v759_v57 = vsel %vm576_vm3, %v758_v54, %v754_v35  ;;  %v363_v58 = vpop.xlane.xlu1 %362  ;;  %v2148_v54 = vsub.s32 %v627_v46, %v1706_v18 }
  0xe9   :  { %v333_v59 = vpop.xlane.xlu0 %332  ;;  %v995_v60 = vrot.slane %v363_v58, %v1802_v19 }
  0xea   :  { %v946_v61 = vrot.slane %v333_v59, %v2069_v41 }
  0xeb   :  { %v996_v62 = vsel %vm576_vm3, %v995_v60, %v991_v42  ;;  %v2157_v60 = vsub.s32 %v641_v51, %v1706_v18 }
  0xec   :  { %v2087_v63 = vsel %vm618_vm10, %v946_v61, %v942_v43  ;;  %v2089_v0 = vpop.xlane.xlu1 %191 }
  0xed   :  { %v141_v1 = vpop.xlane.xlu0 %140  ;;  %v714_v61 = vrot.slane %v2089_v0, %v2144_v52 }
  0xee   :  { %v617_v2 = vrot.slane %v141_v1, %v2069_v41  ;;  %v2163_v1 = vsub.s32 %v648_v53, %v1706_v18 }
  0xf0   :  { %v2093_v3 = vsel %vm618_vm10, %v617_v2, %v612_v49  ;;  %v285_v4 = vpop.xlane.xlu1 %284 }
  0xf1   :  { %v222_v5 = vpop.xlane.xlu0 %221  ;;  %v867_v6 = vrot.slane %v285_v4, %v2069_v41 }
  0xf2   :  { %v763_v19 = vrot.slane %v222_v5, %v1855_v56 }
  0xf3   :  { %v2098_v7 = vsel %vm618_vm10, %v867_v6, %v863_v55  ;;  %v655_v55 = vadd.s32 4294967176, %v1702_v15 }
  0xf4   :  { %v764_v9 = vsel %vm583_vm4, %v763_v19, %v759_v57  ;;  %v366_v10 = vpop.xlane.xlu1 %365  ;;  %v2152_v57 = vsub.s32 %v634_v47, %v1706_v18 }
  0xf5   :  { %v336_v11 = vpop.xlane.xlu0 %335  ;;  %v1000_v12 = vrot.slane %v366_v10, %v1855_v56  ;;  %v2168_v4 = vsub.s32 %v655_v55, %v1706_v18 }
  0xf7   :  { %v1001_v13 = vsel %vm583_vm4, %v1000_v12, %v996_v62  ;;  %v951_v62 = vrot.slane %v336_v11, %v2144_v52  ;;  %v715_v11 = vsel %vm625_vm11, %v714_v61, %v2076_v50 }
  0xf8   :  { %v195_v14 = vpop.xlane.xlu1 %194 }
  0xf9   :  { %v2103_v16 = vpop.xlane.xlu0 %143  ;;  %v719_v15 = vrot.slane %v195_v14, %v2148_v54  ;;  %v952_v18 = vsel %vm625_vm11, %v951_v62, %v2087_v63 }
  0xfb   :  { %v720_v14 = vsel %vm632_vm12, %v719_v15, %v715_v11 }
  0xfc   :  { %v2105_v17 = vpop.xlane.xlu1 %287 }
  0xfd   :  { %v225_v20 = vpop.xlane.xlu0 %224 }
  0xfe   :  { %v768_v22 = vrot.slane %v225_v20, %v1908_v29 }
 0x100   :  { %v2109_v36 = vsel %vm590_vm5, %v768_v22, %v764_v9  ;;  %v369_v23 = vpop.xlane.xlu1 %368 }
 0x101   :  { %v339_v24 = vpop.xlane.xlu0 %338  ;;  %v1005_v25 = vrot.slane %v369_v23, %v1908_v29 }
 0x102   :  { %v956_v2 = vrot.slane %v339_v24, %v2148_v54 }
 0x103   :  { %v2113_v28 = vsel %vm590_vm5, %v1005_v25, %v1001_v13 }
 0x104   :  { %v198_v56 = vpop.xlane.xlu1 %197  ;;  %v957_v20 = vsel %vm632_vm12, %v956_v2, %v952_v18 }
 0x105   :  { %v2115_v30 = vpop.xlane.xlu0 %146  ;;  %v724_v5 = vrot.slane %v198_v56, %v2152_v57 }
 0x106   :  { %v631_v46 = vrot.slane %v2115_v30, %v2148_v54 }
 0x107   :  { %v725_v23 = vsel %vm639_vm13, %v724_v5, %v720_v14 }
 0x108   :  { %v2117_v31 = vpop.xlane.xlu1 %290 }
 0x109   :  { %v2119_v27 = vpop.xlane.xlu0 %227  ;;  %v877_v47 = vrot.slane %v2117_v31, %v2148_v54 }
 0x10c   :  { %v2121_v26 = vpop.xlane.xlu1 %371 }
 0x10d   :  { %v342_v32 = vpop.xlane.xlu0 %341 }
 0x10e   :  { %v961_v6 = vrot.slane %v342_v32, %v2152_v57 }
 0x110   :  { %v201_v33 = vpop.xlane.xlu1 %200  ;;  %v962_v24 = vsel %vm639_vm13, %v961_v6, %v957_v20 }
 0x111   :  { %v2123_v34 = vpop.xlane.xlu0 %149  ;;  %v729_v9 = vrot.slane %v201_v33, %v2157_v60  ;;  %v624_v33 = vrot.slane %v2103_v16, %v2144_v52 }
 0x112   :  { %v638_v16 = vrot.slane %v2123_v34, %v2152_v57 }
 0x113   :  { %v730_v63 = vsel %vm646_vm14, %v729_v9, %v725_v23  ;;  %v626_v61 = vsel %vm625_vm11, %v624_v33, %v2093_v3  ;;  %v773_v23 = vrot.slane %v2119_v27, %v1974_v8 }
 0x114   :  { %v2125_v35 = vpop.xlane.xlu1 %293  ;;  %v633_v15 = vsel %vm632_vm12, %v631_v46, %v626_v61 }
 0x115   :  { %v2127_v37 = vpop.xlane.xlu0 %230 }
 0x118   :  { %v2129_v29 = vpop.xlane.xlu1 %374 }
 0x119   :  { %v345_v38 = vpop.xlane.xlu0 %344 }
 0x11a   :  { %v966_v10 = vrot.slane %v345_v38, %v2157_v60  ;;  %v872_v38 = vrot.slane %v2105_v17, %v2144_v52  ;;  %v882_v17 = vrot.slane %v2125_v35, %v2152_v57 }
 0x11c   :  { %v204_v39 = vpop.xlane.xlu1 %203  ;;  %v967_v56 = vsel %vm646_vm14, %v966_v10, %v962_v24  ;;  %v873_v34 = vsel %vm625_vm11, %v872_v38, %v2098_v7  ;;  %v1010_v24 = vrot.slane %v2121_v26, %v1974_v8  ;;  %v774_v26 = vsel %vm597_vm6, %v773_v23, %v2109_v36 }
 0x11d   :  { %v2131_v40 = vpop.xlane.xlu0 %152  ;;  %v734_v12 = vrot.slane %v204_v39, %v2163_v1  ;;  %v878_v2 = vsel %vm632_vm12, %v877_v47, %v873_v34 }
 0x11e   :  { %v645_v30 = vrot.slane %v2131_v40, %v2157_v60  ;;  %v883_v5 = vsel %vm639_vm13, %v882_v17, %v878_v2 }
 0x11f   :  { %v735_v39 = vsel %vm653_vm15, %v734_v12, %v730_v63  ;;  %v1015_v63 = vrot.slane %v2129_v29, %v2013_v44 }
 0x120   :  { %v2133_v42 = vpop.xlane.xlu1 %296 }
 0x121   :  { %v2135_v43 = vpop.xlane.xlu0 %233  ;;  %v887_v31 = vrot.slane %v2133_v42, %v2157_v60  ;;  %v640_v42 = vsel %vm639_vm13, %v638_v16, %v633_v15 }
 0x122   :  { %v647_v9 = vsel %vm646_vm14, %v645_v30, %v640_v42 }
 0x123   :  { %v888_v7 = vsel %vm646_vm14, %v887_v31, %v883_v5 }
 0x124   :  { %v2140_v48 = vpop.xlane.xlu1 %377 }
 0x125   :  { %v348_v49 = vpop.xlane.xlu0 %347 }
 0x126   :  { %v971_v13 = vrot.slane %v348_v49, %v2163_v1 }
 0x128   :  { %v207_v58 = vpop.xlane.xlu1 %206  ;;  %v972_v45 = vsel %vm653_vm15, %v971_v13, %v967_v56  ;;  %v783_v56 = vrot.slane %v2135_v43, %v2054_v21 }
 0x129   :  { %v2154_v59 = vpop.xlane.xlu0 %155  ;;  %v739_v22 = vrot.slane %v207_v58, %v2168_v4 }
 0x12a   :  { %v652_v35 = vrot.slane %v2154_v59, %v2163_v1 }
 0x12b   :  { %v740_v49 = vsel %vm660_vm0, %v739_v22, %v735_v39 }
 0x12c   :  { %v300_v19 = vpop.xlane.xlu1 %299 }
 0x12d   :  { %v2172_v0 = vpop.xlane.xlu0 %236  ;;  %v892_v62 = vrot.slane %v300_v19, %v2163_v1  ;;  %v654_v19 = vsel %vm653_vm15, %v652_v35, %v647_v9 }
 0x12e   :  { %v788_v27 = vrot.slane %v2172_v0, %v2069_v41 }
 0x12f   :  { %v893_v10 = vsel %vm653_vm15, %v892_v62, %v888_v7 }
 0x130   :  { %v2187_v25 = vpop.xlane.xlu1 %380 }
 0x131   :  { %v351_v50 = vpop.xlane.xlu0 %350  ;;  %v1025_v8 = vrot.slane %v2187_v25, %v2069_v41 }
 0x132   :  { %v976_v32 = vrot.slane %v351_v50, %v2168_v4  ;;  %v778_v50 = vrot.slane %v2127_v37, %v2013_v44  ;;  %v1011_v44 = vsel %vm597_vm6, %v1010_v24, %v2113_v28 }
 0x133   :  { %v1016_v43 = vsel %vm604_vm7, %v1015_v63, %v1011_v44 }
 0x134   :  { %v977_v51 = vsel %vm660_vm0, %v976_v32, %v972_v45  ;;  %v240_v53 = vpop.xlane.xlu1 %239  ;;  %v1020_v32 = vrot.slane %v2140_v48, %v2054_v21  ;;  %v779_v21 = vsel %vm604_vm7, %v778_v50, %v774_v26 }
 0x135   :  { %v159_v55 = vpop.xlane.xlu0 %158  ;;  %v1059_v58 = vsel %vm1057_vm1, %v977_v51, %v740_v49  ;;  %v793_v37 = vrot.slane %v240_v53, %v2144_v52  ;;  %v784_v41 = vsel %vm611_vm9, %v783_v56, %v779_v21 }
 0x136   :  { %1128 = vmatprep.mubr.f32.mxu0 %v1059_v58  ;;  %v659_v40 = vrot.slane %v159_v55, %v2168_v4  ;;  %v1021_v25 = vsel %vm611_vm9, %v1020_v32, %v1016_v43 }
 0x137   :  { %v1026_v46 = vsel %vm618_vm10, %v1025_v8, %v1021_v25 }
 0x138   :  { %v384_v6 = vpop.xlane.xlu1 %383  ;;  %v661_v11 = vsel %vm660_vm0, %v659_v40, %v654_v19 }
 0x139   :  { %v303_v3 = vpop.xlane.xlu0 %302  ;;  %v1030_v29 = vrot.slane %v384_v6, %v2144_v52  ;;  %v789_v52 = vsel %vm618_vm10, %v788_v27, %v784_v41 }
 0x13a   :  { %v897_v59 = vrot.slane %v303_v3, %v2168_v4  ;;  %v1220_v3 = vld [vmem:[%s2301_s2] ss:$0 sm:$0xff] }
 0x13b   :  { %v1031_v51 = vsel %vm625_vm11, %v1030_v29, %v1026_v46 }
 0x13c   :  { %v898_v18 = vsel %vm660_vm0, %v897_v59, %v893_v10  ;;  %v387_v12 = vpop.xlane.xlu1 %386 }
 0x13d   :  { %v243_v13 = vpop.xlane.xlu0 %242  ;;  %v1058_v14 = vsel %vm1057_vm1, %v898_v18, %v661_v11  ;;  %v1035_v48 = vrot.slane %v387_v12, %v2148_v54 }
 0x13e   :  { %1129 = vmatmul.mubr.f32.vlgmr.msra.gmra.mrb[0].mxu0 %v1058_v14  ;;  %v798_v0 = vrot.slane %v243_v13, %v2148_v54  ;;  %v794_v54 = vsel %vm625_vm11, %v793_v37, %v789_v52 }
 0x140   :  { %v390_v20 = vpop.xlane.xlu1 %389  ;;  %v799_v53 = vsel %vm632_vm12, %v798_v0, %v794_v54 }
 0x141   :  { %v246_v22 = vpop.xlane.xlu0 %245  ;;  %v1040_v36 = vrot.slane %v390_v20, %v2152_v57 }
 0x142   :  { %v803_v28 = vrot.slane %v246_v22, %v2152_v57  ;;  %v1036_v57 = vsel %vm632_vm12, %v1035_v48, %v1031_v51 }
 0x143   :  { %v1041_v55 = vsel %vm639_vm13, %v1040_v36, %v1036_v57 }
 0x144   :  { %v393_v33 = vpop.xlane.xlu1 %392  ;;  %v804_v58 = vsel %vm639_vm13, %v803_v28, %v799_v53 }
 0x145   :  { %v249_v38 = vpop.xlane.xlu0 %248  ;;  %v1045_v47 = vrot.slane %v393_v33, %v2157_v60 }
 0x146   :  { %v808_v49 = vrot.slane %v249_v38, %v2157_v60 }
 0x147   :  { %v1046_v60 = vsel %vm646_vm14, %v1045_v47, %v1041_v55 }
 0x148   :  { %v396_v39 = vpop.xlane.xlu1 %395  ;;  %v809_v61 = vsel %vm646_vm14, %v808_v49, %v804_v58 }
 0x149   :  { %v252_v45 = vpop.xlane.xlu0 %251  ;;  %v1050_v16 = vrot.slane %v396_v39, %v2163_v1 }
 0x14a   :  { %v813_v17 = vrot.slane %v252_v45, %v2163_v1 }
 0x14b   :  { %v1051_v1 = vsel %vm653_vm15, %v1050_v16, %v1046_v60 }
 0x14c   :  { %v399_v30 = vpop.xlane.xlu1 %398  ;;  %v814_v62 = vsel %vm653_vm15, %v813_v17, %v809_v61 }
 0x14d   :  { %v255_v31 = vpop.xlane.xlu0 %254  ;;  %v1055_v34 = vrot.slane %v399_v30, %v2168_v4 }
 0x14e   :  { %v818_v35 = vrot.slane %v255_v31, %v2168_v4 }
 0x14f   :  { %v1056_v2 = vsel %vm660_vm0, %v1055_v34, %v1051_v1 }
 0x150   :  { %v819_v15 = vsel %vm660_vm0, %v818_v35, %v814_v62 }
 0x151   :  { %v1060_v40 = vsel %vm1057_vm1, %v1056_v2, %v819_v15 }
 0x152   :  { %1306 = vmatmul.mubr.f32.vlgmr.msra.gmra.mrb[0].mxu1 %v1060_v40 }
 0x211   :  { %v1253_v42 = vpop.f32.mrb[0].mxu0 }
 0x212   :  { %v1254_v5 = vpop.f32.mrb[1].mxu0 }
 0x213   :  { %v1255_v6 = vadd.f32 %v1254_v5, %v1253_v42 }
 0x215   :  { %v1131_v9 = vadd.f32 %v1255_v6, %v1220_v3 }
 0x225   :  { %v1200_v4 = vpop.f32.mrb[0].mxu1 }
 0x226   :  { %v1201_v7 = vadd.f32 %v1200_v4, %v1131_v9  ;;  %v1307_v59 = vpop.f32.mrb[1].mxu1 }
 0x228   :  { %v1204_v19 = vmax.f32 %v1201_v7, 0.0 }
 0x22a   :  { %1205 = vst [vmem:[#allocation2] sm:$0x3] %v1204_v19 }
 0x22b   :  { %1379 = shalt.err (!%p1376_p4)
}
 0x22c   :  { %s1380_s2 = scalar_lea.hbm %s2302_s3, 32 }
 0x22d   :  { %p1381_p5 = scmp.ne.s32.totalorder %s2302_s3, %s1380_s2  ;;  %p1384_p6 = scmp.lt.u32.totalorder %s1380_s2, %s2302_s3 }
 0x22f   :  { %p1386_p7 = pnand %p1384_p6, %p1381_p5 }
 0x231   :  { %1389 = shalt.err (!%p1386_p7)
}
 0x232   :  { %1215 = dma.vmem_to_hbm [thread:$0]  %s1213_s4, 32, %s2302_s3, [#allocation3]  }
 0x233   :  { %1390 = dma.done.wait [#allocation3], 32  }
 0x234   :  { %1391 = vsyncadd [#allocation3], 4294967264 }
 0x235   :  { %1219 = vsyncpa [#allocation3], 1 }

</bundles_post_ra>
